<compile_context>
chip_gen: v6e
topology: v6e:2x2x1
jax: 0.10.0
libtpu: 0.0.40
codegen_flags: <defaults>
</compile_context>

<pallas_src>
import math
import jax
import jax.numpy as jnp
from jax.experimental import pallas as pl
from jax.experimental.pallas import tpu as pltpu


def _round_up(x, m):
    return ((x + m - 1) // m) * m


# ----------------------------------------------------------------------------
# Pallas kernel: fused im2col-matmul conv (BN scale folded into W) + shift + Mish
# ----------------------------------------------------------------------------
def _conv_bn_mish_kernel(x_ref, w_ref, shift_ref, o_ref):
    # x:(TILE_M, Kdim) bf16   w:(Kdim, Cout) bf16 (BN scale pre-folded)
    # shift:(1, Cout) f32     o:(TILE_M, Cout) bf16
    y = jnp.dot(x_ref[...], w_ref[...],
                preferred_element_type=jnp.float32) + shift_ref[...]
    # Mish(y) = y * tanh(softplus(y));
    # tanh(softplus(y)) = (e^2 + 2e) / (e^2 + 2e + 2) with e = exp(y).
    # Evaluate via t = exp(-|y|) so nothing overflows:
    #   y >= 0:  (1 + 2t)      / (1 + 2t + 2t^2)
    #   y <  0:  (t^2 + 2t)    / (t^2 + 2t + 2)
    # One EUP exp + one EUP approximate reciprocal per element (f32 math).
    t = jnp.exp(-jnp.abs(y))
    tt = t * t
    two_t = 2.0 * t
    pos = y >= 0.0
    num = jnp.where(pos, 1.0 + two_t, tt + two_t)
    den = num + jnp.where(pos, 2.0 * tt, 2.0)
    o_ref[...] = (y * num * pl.reciprocal(den, approx=True)).astype(o_ref.dtype)


def pallas_conv_bn_mish(patches, w2d_scaled, shift, *, tile_m=512, min_tiles=2,
                        out_dtype=jnp.bfloat16):
    """patches:(M,Kdim) bf16, w2d_scaled:(Kdim,Cout), shift:(1,Cout) f32
    -> (M, Cout) out_dtype."""
    M, Kdim = patches.shape
    Cout = w2d_scaled.shape[1]
    # Keep >= min_tiles grid steps (v7x megacore sharding of the "parallel"
    # axis) and round the tile to 16 rows (bf16 sublane pack).
    tile_m = min(tile_m, max(16, _round_up(pl.cdiv(M, min_tiles), 16)))
    Mp = _round_up(M, tile_m)
    if Mp != M:
        patches = jnp.pad(patches, ((0, Mp - M), (0, 0)))
    grid = (Mp // tile_m,)
    out = pl.pallas_call(
        _conv_bn_mish_kernel,
        out_shape=jax.ShapeDtypeStruct((Mp, Cout), out_dtype),
        grid=grid,
        in_specs=[
            pl.BlockSpec((tile_m, Kdim), lambda i: (i, 0)),   # patches tiled over M
            pl.BlockSpec((Kdim, Cout), lambda i: (0, 0)),     # weight VMEM-resident
            pl.BlockSpec((1, Cout), lambda i: (0, 0)),        # BN/bias shift resident
        ],
        out_specs=pl.BlockSpec((tile_m, Cout), lambda i: (i, 0)),
        compiler_params=pltpu.CompilerParams(
            dimension_semantics=("parallel",)),               # shard M tiles across TCs
    )(patches, w2d_scaled.astype(jnp.bfloat16), shift)
    return out[:M]


# ----------------------------------------------------------------------------
# JAX glue
# ----------------------------------------------------------------------------
def im2col(x, ksize, stride, pad):
    """(B, C, H, W) -> (B*Hout*Wout, C*ksize*ksize) bf16 patches, order (c, ky, kx)."""
    B, C, H, W = x.shape
    Hout = (H + 2 * pad - ksize) // stride + 1
    Wout = (W + 2 * pad - ksize) // stride + 1
    xb = x.astype(jnp.bfloat16)                # cast BEFORE the k*k expansion
    xp = jnp.pad(xb, ((0, 0), (0, 0), (pad, pad), (pad, pad)))
    cols = []
    for ky in range(ksize):
        for kx in range(ksize):
            sl = xp[:, :, ky:ky + stride * (Hout - 1) + 1:stride,
                          kx:kx + stride * (Wout - 1) + 1:stride]
            cols.append(sl)                                   # (B, C, Hout, Wout)
    patches = jnp.stack(cols, axis=2)                         # (B, C, K*K, Hout, Wout)
    patches = jnp.transpose(patches, (0, 3, 4, 1, 2))         # (B, Hout, Wout, C, K*K)
    return patches.reshape(B * Hout * Wout, C * ksize * ksize), Hout, Wout


def init_params(key, in_ch, out_ch, ksize):
    k1, k2 = jax.random.split(key)
    fan_in = in_ch * ksize * ksize
    bound = 1.0 / math.sqrt(fan_in)
    conv_w = jax.random.uniform(k1, (out_ch, in_ch, ksize, ksize),
                                jnp.float32, -bound, bound)
    conv_b = jax.random.uniform(k2, (out_ch,), jnp.float32, -bound, bound)
    return {
        'conv_w': conv_w, 'conv_b': conv_b,
        'bn_gamma': jnp.ones((out_ch,), jnp.float32),
        'bn_beta': jnp.zeros((out_ch,), jnp.float32),
        'bn_mean': jnp.zeros((out_ch,), jnp.float32),
        'bn_var': jnp.ones((out_ch,), jnp.float32),
        'bn_eps': 1e-5,
    }


def conv_bn_mish_forward(params, x, kernel_size, stride, channels_last=False):
    """Matches ConvBN.forward: conv(pad=(k-1)//2) -> BatchNorm2d(eval) -> Mish.

    Set channels_last=True to skip the final NCHW transpose (keeps the result
    lane-dense NHWC for a fused downstream consumer)."""
    B, Cin, H, W = x.shape
    pad = (kernel_size - 1) // 2
    patches, Hout, Wout = im2col(x, kernel_size, stride, pad)     # (M, Cin*K*K) bf16
    Cout = params['conv_w'].shape[0]
    # Fold conv bias + eval-mode BatchNorm into the weights (scale) and a
    # per-channel shift; scale is folded in f32 before the bf16 cast.
    s = params['bn_gamma'] / jnp.sqrt(params['bn_var'] + params['bn_eps'])
    w2d_scaled = params['conv_w'].reshape(Cout, -1).T * s[None, :]     # (Cin*K*K, Cout)
    shift = ((params['conv_b'] - params['bn_mean']) * s + params['bn_beta'])[None, :]
    out = pallas_conv_bn_mish(patches, w2d_scaled, shift)             # (M, Cout) bf16
    out = out.reshape(B, Hout, Wout, Cout)
    if channels_last:
        return out                                                    # NHWC
    return jnp.transpose(out, (0, 3, 1, 2))                           # NCHW


def reference_forward(params, x, kernel_size, stride):
    """Pure-JAX f32 reference for a loose correctness check."""
    pad = (kernel_size - 1) // 2
    y = jax.lax.conv_general_dilated(
        x, params['conv_w'], (stride, stride), [(pad, pad), (pad, pad)],
        dimension_numbers=('NCHW', 'OIHW', 'NCHW'))
    y = y + params['conv_b'][None, :, None, None]
    s = params['bn_gamma'] / jnp.sqrt(params['bn_var'] + params['bn_eps'])
    y = ((y - params['bn_mean'][None, :, None, None]) * s[None, :, None, None]
         + params['bn_beta'][None, :, None, None])
    sp = jnp.maximum(y, 0.0) + jnp.log1p(jnp.exp(-jnp.abs(y)))
    return y * jnp.tanh(sp)


# ----------------------------------------------------------------------------
if __name__ == "__main__":
    key = jax.random.PRNGKey(0)
    kp, kx = jax.random.split(key)

    # Small shapes implied by the module: B=2, Cin=4, 16x16, Cout=128, k=3, s=1.
    B, Cin, H, W = 2, 4, 16, 16
    Cout, ksize, stride = 128, 3, 1

    params = init_params(kp, Cin, Cout, ksize)
    x = jax.random.normal(kx, (B, Cin, H, W), jnp.float32)

    out = conv_bn_mish_forward(params, x, ksize, stride)
    jax.block_until_ready(out)

    ref = reference_forward(params, x, ksize, stride)
    err = float(jnp.max(jnp.abs(out.astype(jnp.float32) - ref)))
    assert out.shape == (B, Cout, H // stride, W // stride), out.shape
    # bf16 patches/weights + bf16 output store + approx reciprocal tolerance.
    assert err < 7.5e-2, f"max abs error {err}"

    print("KERNEL_OK")
</pallas_src>

<mosaic_0001>
module attributes {stable_mosaic.version = 11 : i64} {
  func.func @_conv_bn_mish_kernel(%arg0: i32, %arg1: memref<256x36xbf16, #tpu.memory_space<vmem>>, %arg2: memref<36x128xbf16, #tpu.memory_space<vmem>>, %arg3: memref<1x128xf32, #tpu.memory_space<vmem>>, %arg4: memref<256x128xbf16, #tpu.memory_space<vmem>>) attributes {dimension_semantics = [#tpu.dimension_semantics<parallel>], iteration_bounds = array<i64: 2>, scalar_prefetch = 0 : i64, scratch_operands = 0 : i64, tpu.core_type = #tpu.core_type<tc>, window_params = [{transform_indices = @transform_0, window_bounds = array<i64: 256, 36>}, {pipeline_mode = #tpu.pipeline_mode<synchronous>, transform_indices = @transform_1, window_bounds = array<i64: 36, 128>}, {pipeline_mode = #tpu.pipeline_mode<synchronous>, transform_indices = @transform_2, window_bounds = array<i64: 1, 128>}, {transform_indices = @transform_3, window_bounds = array<i64: 256, 128>}]} {
    %c0 = arith.constant 0 : index
    %c0_0 = arith.constant 0 : index
    %0 = vector.load %arg1[%c0, %c0_0] : memref<256x36xbf16, #tpu.memory_space<vmem>>, vector<256x36xbf16>
    %c0_1 = arith.constant 0 : index
    %c0_2 = arith.constant 0 : index
    %1 = vector.load %arg2[%c0_1, %c0_2] : memref<36x128xbf16, #tpu.memory_space<vmem>>, vector<36x128xbf16>
    %cst = arith.constant dense<0.000000e+00> : vector<256x128xf32>
    %2 = tpu.matmul %0, %1, %cst {dimension_numbers = #tpu.dot_dimension_numbers<[1], [0], [0], [1], [0, 0, 1, 1], [], []>} : vector<256x36xbf16>, vector<36x128xbf16>, vector<256x128xf32> -> vector<256x128xf32>
    %c0_3 = arith.constant 0 : index
    %c0_4 = arith.constant 0 : index
    %3 = vector.load %arg3[%c0_3, %c0_4] : memref<1x128xf32, #tpu.memory_space<vmem>>, vector<1x128xf32>
    %4 = vector.broadcast %3 : vector<1x128xf32> to vector<256x128xf32>
    %5 = arith.addf %2, %4 : vector<256x128xf32>
    %6 = math.absf %5 : vector<256x128xf32>
    %cst_5 = arith.constant 0.000000e+00 : f32
    %7 = vector.broadcast %cst_5 : f32 to vector<256x128xf32>
    %8 = arith.subf %7, %6 : vector<256x128xf32>
    %9 = math.exp %8 : vector<256x128xf32>
    %10 = arith.mulf %9, %9 : vector<256x128xf32>
    %cst_6 = arith.constant 2.000000e+00 : f32
    %11 = vector.broadcast %cst_6 : f32 to vector<256x128xf32>
    %12 = arith.mulf %11, %9 : vector<256x128xf32>
    %cst_7 = arith.constant 0.000000e+00 : f32
    %13 = vector.broadcast %cst_7 : f32 to vector<256x128xf32>
    %14 = arith.cmpf oge, %5, %13 : vector<256x128xf32>
    %cst_8 = arith.constant 1.000000e+00 : f32
    %15 = vector.broadcast %cst_8 : f32 to vector<256x128xf32>
    %16 = arith.addf %15, %12 : vector<256x128xf32>
    %17 = arith.addf %10, %12 : vector<256x128xf32>
    %18 = arith.select %14, %16, %17 : vector<256x128xi1>, vector<256x128xf32>
    %cst_9 = arith.constant 2.000000e+00 : f32
    %19 = vector.broadcast %cst_9 : f32 to vector<256x128xf32>
    %20 = arith.mulf %19, %10 : vector<256x128xf32>
    %cst_10 = arith.constant 2.000000e+00 : f32
    %21 = vector.broadcast %cst_10 : f32 to vector<256x128xf32>
    %22 = arith.select %14, %20, %21 : vector<256x128xi1>, vector<256x128xf32>
    %23 = arith.addf %18, %22 : vector<256x128xf32>
    %24 = arith.mulf %5, %18 : vector<256x128xf32>
    %25 = tpu.reciprocal %23 {approx = true} : vector<256x128xf32> -> vector<256x128xf32>
    %26 = arith.mulf %24, %25 : vector<256x128xf32>
    %27 = arith.truncf %26 : vector<256x128xf32> to vector<256x128xbf16>
    %c0_11 = arith.constant 0 : index
    %c0_12 = arith.constant 0 : index
    %28 = vector.load %arg4[%c0_11, %c0_12] : memref<256x128xbf16, #tpu.memory_space<vmem>>, vector<256x128xbf16>
    tpu.vector_store %arg4[%c0_11, %c0_12], %27 {strides = array<i32>} : memref<256x128xbf16, #tpu.memory_space<vmem>>, vector<256x128xbf16>,
    return
  }
  func.func @transform_0(%arg0: i32) -> (i32, i32) {
    %c0_i32 = arith.constant 0 : i32
    %c0_i32_0 = arith.constant 0 : i32
    return %arg0, %c0_i32 : i32, i32
  }
  func.func @transform_1(%arg0: i32) -> (i32, i32) {
    %c0_i32 = arith.constant 0 : i32
    %c0_i32_0 = arith.constant 0 : i32
    %c0_i32_1 = arith.constant 0 : i32
    return %c0_i32, %c0_i32_0 : i32, i32
  }
  func.func @transform_2(%arg0: i32) -> (i32, i32) {
    %c0_i32 = arith.constant 0 : i32
    %c0_i32_0 = arith.constant 0 : i32
    %c0_i32_1 = arith.constant 0 : i32
    return %c0_i32, %c0_i32_0 : i32, i32
  }
  func.func @transform_3(%arg0: i32) -> (i32, i32) {
    %c0_i32 = arith.constant 0 : i32
    %c0_i32_0 = arith.constant 0 : i32
    return %arg0, %c0_i32 : i32, i32
  }
}

</mosaic_0001>

<bundles_post_ra>
// kernel: tpu_custom_call.1
= control target key start
LH: loop header
LB: loop body
LE: loop exit
PB: predicated region body
PF: predicated region fallthrough
CT: control target
= control target key end

     0   :  { %8 = vsyncpa [#allocation3], 0  ;;  %s2378_s0 = inlined_call_operand.vmem [shape: bf16[512,36], index: 0, kind: input, shape index: {}]   ;;  %s2379_s1 = inlined_call_operand.vmem [shape: bf16[36,128], index: 1, kind: input, shape index: {}]   ;;  %s2380_s2 = inlined_call_operand.vmem [shape: f32[1,128], index: 2, kind: input, shape index: {}]   ;;  %s2381_s3 = inlined_call_operand.hbm [shape: bf16[512,128], index: 3, kind: output, shape index: {}]  }
   0x1   :  { %10 = vsyncpa [#allocation3 + $0x1], 0  ;;  %s1820_s12 = smov 0   ;;  %s1822_s13 = smov 0  }
   0x2   :  { %s1824_s14 = smov 0   ;;  %s1826_s15 = smov 0  }
   0x3 LB: > { %s1841_s16 = sadd.s32 4294967295, %s1795_s15   ;;  %s1274_s17 = sadd.s32 4294967294, %s1795_s15   ;;  %s1795_s15 = sphi %s1826_s15, %s2387_s15   ;;  %s1791_s14 = sphi %s1824_s14, %s2386_s14   ;;  %s1787_s13 = sphi %s1822_s13, %s2385_s13   ;;  %s1783_s12 = sphi %s1820_s12, %s2384_s12  }
   0x4   : > { %s1845_s18 = sadd.s32 1, %s1795_s15   ;;  %s91_s19 = sadd.s32 1, %s1791_s14 }
   0x5   : > { %s88_s20 = ssub.s32 %s1795_s15, %s1845_s18  ;;  %p101_p0 = scmp.ne.s32.totalorder %s1791_s14, %s1787_s13 }
   0x6   : > { %p89_p1 = scmp.eq.s32.totalorder %s88_s20, 0  ;;  %p102_p2 = scmp.eq.s32.totalorder %s1841_s16, 1 }
   0x7   : > { %p107_p3 = scmp.ne.s32.totalorder %s1787_s13, %s1783_s12  ;;  %p108_p4 = scmp.eq.s32.totalorder %s1274_s17, 1 }
   0x8   : > { %s1856_s21 = scalar_select %p89_p1, %s1791_s14, %s91_s19  }
   0x9   : > { %p1858_p5 = por %p102_p2, %p101_p0  ;;  %p1862_p6 = por %p108_p4, %p107_p3 }
   0xa   : > { %p1277_p7 = scmp.ge.s32.totalorder %s1795_s15, 1  ;;  %p141_p8 = scmp.lt.s32.totalorder %s1795_s15, 3 }
   0xc   : > { %p142_p9 = pnand %p1277_p7, %p141_p8 }
   0xd   : > { %s1279_s28 = sshll.u32 (!%p142_p9), %s1841_s16, 5  ;;  %s162_s10 = sand.u32 (!%p142_p9), 1, %s1787_s13  }
   0xe   : > { %145 = sbr.rel (%p142_p9) target bundleno = 398 (0x18e), region = 32  ;;  %p166_p10 = scmp.lt.s32.totalorder (!%p142_p9), %s1279_s28, 63 }
   0xf   : > { %s1278_s11 = sshll.u32 (!%p142_p9), %s162_s10, 7  ;;  %s1386_s19 = sshll.u32 (!%p142_p9), %s1841_s16, 11 }
  0x10   : > { %s2074_s17 = scalar_lea.vmem (!%p142_p9), [#allocation2], %s1278_s11  ;;  %s2331_s26 = scalar_lea.hbm (!%p142_p9), %s2381_s3, %s1386_s19 }
  0x11   : > { %s1212_s20 = sshll.u32 (!%p142_p9), %s2074_s17, 4  ;;  %s2338_s27 = scalar_lea.sflag (!%p142_p9), [#allocation3], %s162_s10  ;;  %s2333_s20 = int_to_ptr.vmem [resolvable:$true] %s1212_s20 }
  0x12   : > { %s1735_s16 = scalar_lea.vmem (!%p142_p9), %s2333_s20, 2048 }
  0x13   : > { %v1588_v0 = vld [vmem:[%s2379_s1 + $0x10] ss:$0 sps:$4 sm:$0x33]   ;;  %vm361_vm0 = vcmask 1041408   ;;  %v1589_v1 = vld [vmem:[%s2379_s1 + $0x8] sm:$0xff]   ;;  %v1590_v3 = vld [vmem:[%s2379_s1] sm:$0xff]   ;;  %p1736_p11 = scmp.ne.s32.totalorder %s2333_s20, %s1735_s16 }
  0x14   : > { %1545 = vmatprep.subr.msk.bf16.mxu0 %vm361_vm0, %v1588_v0  ;;  %1546 = vmatprep.subr.msk.bf16.mxu1 %vm361_vm0, %v1588_v0  ;;  %v363_v2 = vsel %vm361_vm0, %v1588_v0, 0  ;;  %s2389_s28 = smov (!%p166_p10, %s1279_s28), 63  ;;  %vm312_vm1 = vcmask 293888   ;;  %v1918_v20 = vld [vmem:[%s2380_s2] ss:$0 sm:$0xff] }
  0x15   : > { %1502 = vmatpush3.bf16.msra.mxu0 %v363_v2  ;;  %1542 = vmatpush3.bf16.msra.mxu1 %v363_v2  ;;  %s1280_s4 = sshll.u32 %s2389_s28, 2  ;;  %p1737_p12 = pnand %p1736_p11, %p1858_p5 }
  0x16   : > { %1503 = vmatprep.subr.bf16.mxu0 %v1589_v1  ;;  %1540 = vmatprep.subr.bf16.mxu1 %v1589_v1  ;;  %s1881_s7 = scalar_lea.vmem %s2378_s0, %s1280_s4  ;;  %s1797_s28 = smov [#allocation2]  }
  0x17   : > { %v1591_v4 = vld [vmem:[%s1881_s7] sm:$0xff]   ;;  %v1593_v6 = vld [vmem:[%s1881_s7 + $0x8] sm:$0xff]   ;;  %v1595_v8 = vld [vmem:[%s1881_s7 + $0x10] sm:$0xff]   ;;  %p1738_p13 = pneg %p1737_p12  ;;  %s1739_s29 = sshll.u32 %s1797_s28, 4  ;;  %s1740_s29 = int_to_ptr.vmem [resolvable:$false] %s1739_s29 }
  0x18   : > { %v1592_v5 = vld [vmem:[%s1881_s7 + $0x40] sm:$0xff]   ;;  %1507 = vmatprep.mubr.msk.bf16.mxu0 %vm312_vm1, %v1591_v4  ;;  %v1594_v7 = vld [vmem:[%s1881_s7 + $0x48] sm:$0xff]   ;;  %v1596_v9 = vld [vmem:[%s1881_s7 + $0x50] sm:$0xff]   ;;  %s1741_s30 = scalar_lea.vmem %s1740_s29, 4096  ;;  %p1742_p0 = scmp.lt.s32.totalorder %s2333_s20, %s1740_s29 }
  0x19   : > { %1504 = vmatpush3.bf16.msra.mxu0 %v1589_v1  ;;  %1543 = vmatpush3.bf16.msra.mxu1 %v1589_v1  ;;  %v1597_v10 = vld [vmem:[%s1881_s7 + $0x18] sm:$0xff]   ;;  %v1599_v12 = vld [vmem:[%s1881_s7 + $0x20] sm:$0xff]   ;;  %v1601_v14 = vld [vmem:[%s1881_s7 + $0x28] sm:$0xff]   ;;  %p1743_p1 = scmp.lt.s32.totalorder %s1741_s30, %s1735_s16 }
  0x1a   : > { %1505 = vmatprep.subr.bf16.mxu0 %v1590_v3  ;;  %1541 = vmatprep.subr.bf16.mxu1 %v1590_v3  ;;  %v1598_v11 = vld [vmem:[%s1881_s7 + $0x58] sm:$0xff]   ;;  %v1600_v13 = vld [vmem:[%s1881_s7 + $0x60] sm:$0xff]   ;;  %v1602_v15 = vld [vmem:[%s1881_s7 + $0x68] sm:$0xff]  }
  0x1b   : > { %1523 = vmatprep.mubr.msk.bf16.mxu1 %vm312_vm1, %v1592_v5  ;;  %v1603_v16 = vld [vmem:[%s1881_s7 + $0x30] sm:$0xff]   ;;  %v1605_v18 = vld [vmem:[%s1881_s7 + $0x38] sm:$0xff]   ;;  %p1744_p2 = por %p1743_p1, %p1742_p0 }
  0x1c   : > { %v1604_v17 = vld [vmem:[%s1881_s7 + $0x70] sm:$0xff]   ;;  %v1606_v19 = vld [vmem:[%s1881_s7 + $0x78] sm:$0xff]  }
  0x1d   : > { %1506 = vmatpush3.bf16.msra.mxu0 %v1590_v3  ;;  %1544 = vmatpush3.bf16.msra.mxu1 %v1590_v3  ;;  %p1745_p3 = pnand %p1744_p2, %p1738_p13 }
  0x20   : > { %1508 = vmatmul.mubr.msk.bf16.vlgmr.msra.gmra.mxu0 %vm312_vm1, %v1593_v6  ;;  %1524 = vmatmul.mubr.msk.bf16.vlgmr.msra.gmra.mxu1 %vm312_vm1, %v1594_v7 }
  0x21   : > { %1511 = vmatprep.mubr.msk.bf16.mxu0 %vm312_vm1, %v1595_v8  ;;  %1527 = vmatprep.mubr.msk.bf16.mxu1 %vm312_vm1, %v1596_v9 }
  0x28   : > { %1512 = vmatmul.mubr.msk.bf16.gmra.mxu0 %vm312_vm1, %v1597_v10  ;;  %1528 = vmatmul.mubr.msk.bf16.gmra.mxu1 %vm312_vm1, %v1598_v11 }
  0x29   : > { %1515 = vmatprep.mubr.msk.bf16.mxu0 %vm312_vm1, %v1599_v12  ;;  %1531 = vmatprep.mubr.msk.bf16.mxu1 %vm312_vm1, %v1600_v13 }
  0x30   : > { %1516 = vmatmul.mubr.msk.bf16.gmra.mxu0 %vm312_vm1, %v1601_v14  ;;  %1532 = vmatmul.mubr.msk.bf16.gmra.mxu1 %vm312_vm1, %v1602_v15 }
  0x31   : > { %1519 = vmatprep.mubr.msk.bf16.mxu0 %vm312_vm1, %v1603_v16  ;;  %1535 = vmatprep.mubr.msk.bf16.mxu1 %vm312_vm1, %v1604_v17 }
  0x38   : > { %1520 = vmatmul.mubr.msk.bf16.gmra.mxu0 %vm312_vm1, %v1605_v18  ;;  %1536 = vmatmul.mubr.msk.bf16.gmra.mxu1 %vm312_vm1, %v1606_v19 }
  0xe0   : > { %v1509_v21 = vpop.f32.mrf.mxu0  ;;  %v1525_v22 = vpop.f32.mrf.mxu1 }
  0xe1   : > { %v1921_v23 = vadd.f32 %v1509_v21, %v1918_v20  ;;  %v1924_v24 = vadd.f32 %v1525_v22, %v1918_v20 }
  0xe2   : > { %v399_v25 = vpop.f32.mrf.mxu0  ;;  %v463_v26 = vpop.f32.mrf.mxu1 }
  0xe3   : > { %v528_v27 = vand.u32 2147483647, %v1921_v23  ;;  %v544_v28 = vand.u32 2147483647, %v1924_v24  ;;  %v1929_v29 = vadd.f32 %v1918_v20, %v399_v25  ;;  %v1932_v30 = vadd.f32 %v1918_v20, %v463_v26 }
  0xe4   : > { %v1510_v31 = vpop.f32.mrf.mxu0  ;;  %v1526_v32 = vpop.f32.mrf.mxu1  ;;  %vm720_vm2 = vcmp.ge.f32.partialorder %v1921_v23, 0.0  ;;  %vm736_vm3 = vcmp.ge.f32.partialorder %v1924_v24, 0.0 }
  0xe5   : > { %v560_v33 = vsub.f32 0.0, %v528_v27  ;;  %v576_v34 = vsub.f32 0.0, %v544_v28  ;;  %v1935_v35 = vadd.f32 %v1510_v31, %v1918_v20  ;;  %v1938_v36 = vadd.f32 %v1526_v32, %v1918_v20 }
  0xe6   : > { %v526_v37 = vand.u32 2147483647, %v1929_v29  ;;  %v542_v38 = vand.u32 2147483647, %v1932_v30  ;;  %v402_v39 = vpop.f32.mrf.mxu0  ;;  %v466_v40 = vpop.f32.mrf.mxu1  ;;  %vm718_vm4 = vcmp.ge.f32.partialorder %v1929_v29, 0.0  ;;  %vm734_vm5 = vcmp.ge.f32.partialorder %v1932_v30, 0.0 }
  0xe7   : > { %v594_v41 = vmul.f32 1.442695, %v560_v33  ;;  %v626_v42 = vmul.f32 1.442695, %v576_v34  ;;  %v529_v43 = vand.u32 2147483647, %v1935_v35  ;;  %v1944_v44 = vadd.f32 %v1918_v20, %v402_v39 }
  0xe8   : > { %v558_v45 = vsub.f32 0.0, %v526_v37  ;;  %v574_v46 = vsub.f32 0.0, %v542_v38  ;;  %v545_v47 = vand.u32 2147483647, %v1938_v36  ;;  %v1513_v48 = vpop.f32.mrf.mxu0  ;;  %v1529_v51 = vpop.f32.mrf.mxu1  ;;  %v1949_v57 = vadd.f32 %v1918_v20, %v466_v40 }
  0xe9   : > { %1607 = vpow2.f32 %v594_v41  ;;  %v561_v49 = vsub.f32 0.0, %v529_v43  ;;  %v527_v50 = vand.u32 2147483647, %v1944_v44  ;;  %v1952_v59 = vadd.f32 %v1513_v48, %v1918_v20 }
  0xea   : > { %1609 = vpow2.f32 %v626_v42  ;;  %v590_v52 = vmul.f32 1.442695, %v558_v45  ;;  %v622_v53 = vmul.f32 1.442695, %v574_v46  ;;  %v577_v54 = vsub.f32 0.0, %v545_v47  ;;  %v415_v55 = vpop.f32.mrf.mxu0  ;;  %v479_v62 = vpop.f32.mrf.mxu1 }
  0xeb   : > { %v596_v56 = vmul.f32 1.442695, %v561_v49  ;;  %v559_v58 = vsub.f32 0.0, %v527_v50  ;;  %v1955_v60 = vadd.f32 %v1529_v51, %v1918_v20  ;;  %v543_v61 = vand.u32 2147483647, %v1949_v57 }
  0xec   : > { %1611 = vpow2.f32 %v590_v52  ;;  %v628_v63 = vmul.f32 1.442695, %v577_v54  ;;  %v532_v0 = vand.u32 2147483647, %v1952_v59  ;;  %v1514_v2 = vpop.f32.mrf.mxu0  ;;  %v1961_v4 = vadd.f32 %v1918_v20, %v415_v55 }
  0xed   : > { %1613 = vpow2.f32 %v622_v53  ;;  %v548_v1 = vand.u32 2147483647, %v1955_v60  ;;  %v575_v3 = vsub.f32 0.0, %v543_v61  ;;  %v592_v5 = vmul.f32 1.442695, %v559_v58 }
  0xee   : > { %1615 = vpow2.f32 %v596_v56  ;;  %v564_v6 = vsub.f32 0.0, %v532_v0  ;;  %v1964_v8 = vadd.f32 %v1918_v20, %v479_v62  ;;  %v530_v10 = vand.u32 2147483647, %v1961_v4 }
  0xef   : > { %v580_v7 = vsub.f32 0.0, %v548_v1  ;;  %v624_v9 = vmul.f32 1.442695, %v575_v3  ;;  %v1968_v11 = vadd.f32 %v1514_v2, %v1918_v20  ;;  %1617 = vpow2.f32 %v628_v63 }
  0xf0   : > { %v602_v12 = vmul.f32 1.442695, %v564_v6  ;;  %v546_v13 = vand.u32 2147483647, %v1964_v8  ;;  %1619 = vpow2.f32 %v592_v5  ;;  %v562_v16 = vsub.f32 0.0, %v530_v10  ;;  %v1530_v6 = vpop.f32.mrf.mxu1 }
  0xf1   : > { %v634_v14 = vmul.f32 1.442695, %v580_v7  ;;  %v533_v15 = vand.u32 2147483647, %v1968_v11  ;;  %1621 = vpow2.f32 %v624_v9  ;;  %vm721_vm6 = vcmp.ge.f32.partialorder %v1935_v35, 0.0 }
  0xf2   : > { %v578_v17 = vsub.f32 0.0, %v546_v13  ;;  %1623 = vpow2.f32 %v602_v12  ;;  %v598_v28 = vmul.f32 1.442695, %v562_v16  ;;  %vm737_vm7 = vcmp.ge.f32.partialorder %v1938_v36, 0.0 }
  0xf3   : > { %v565_v18 = vsub.f32 0.0, %v533_v15  ;;  %1625 = vpow2.f32 %v634_v14  ;;  %vm719_vm8 = vcmp.ge.f32.partialorder %v1944_v44, 0.0  ;;  %vm735_vm9 = vcmp.ge.f32.partialorder %v1949_v57, 0.0 }
  0xf4   : > { %v630_v31 = vmul.f32 1.442695, %v578_v17  ;;  %1627 = vpow2.f32 %v598_v28  ;;  %vm724_vm10 = vcmp.ge.f32.partialorder %v1952_v59, 0.0  ;;  %vm740_vm11 = vcmp.ge.f32.partialorder %v1955_v60, 0.0 }
  0xf5   : > { %v604_v38 = vmul.f32 1.442695, %v565_v18  ;;  %vm722_vm12 = vcmp.ge.f32.partialorder %v1961_v4, 0.0  ;;  %vm725_vm13 = vcmp.ge.f32.partialorder %v1968_v11, 0.0  ;;  %vm738_vm14 = vcmp.ge.f32.partialorder %v1964_v8, 0.0 }
  0xf6   : > { %v1608_v19 = vpop.eup %1607  ;;  %1629 = vpow2.f32 %v630_v31 }
  0xf7   : > { %v1610_v21 = vpop.eup %1609  ;;  %v656_v22 = vmul.f32 %v1608_v19, %v1608_v19  ;;  %v688_v25 = vmul.f32 2.0, %v1608_v19  ;;  %1631 = vpow2.f32 %v604_v38 }
  0xf8   : > { %v672_v26 = vmul.f32 %v1610_v21, %v1610_v21  ;;  %v704_v27 = vmul.f32 2.0, %v1610_v21 }
  0xf9   : > { %v1612_v32 = vpop.eup %1611  ;;  %v752_v33 = vadd.f32 1.0, %v688_v25  ;;  %v784_v34 = vadd.f32 %v688_v25, %v656_v22  ;;  %v848_v37 = vmul.f32 2.0, %v656_v22  ;;  %v2012_v25 = vadd.f32 %v1530_v6, %v1918_v20 }
  0xfa   : > { %v1614_v39 = vpop.eup %1613  ;;  %v768_v40 = vadd.f32 1.0, %v704_v27  ;;  %v800_v41 = vadd.f32 %v704_v27, %v672_v26  ;;  %v864_v42 = vmul.f32 2.0, %v672_v26  ;;  %v654_v43 = vmul.f32 %v1612_v32, %v1612_v32 }
  0xfb   : > { %v1979_v45 = vsel %vm720_vm2, %v752_v33, %v784_v34  ;;  %v880_v46 = vsel %vm720_vm2, %v848_v37, 2.0  ;;  %v686_v47 = vmul.f32 2.0, %v1612_v32  ;;  %v670_v48 = vmul.f32 %v1614_v39, %v1614_v39  ;;  %v1616_v49 = vpop.eup %1615 }
  0xfc   : > { %v912_v50 = vadd.f32 %v880_v46, %v1979_v45  ;;  %v1986_v51 = vsel %vm736_vm3, %v768_v40, %v800_v41  ;;  %v896_v52 = vsel %vm736_vm3, %v864_v42, 2.0  ;;  %v846_v55 = vmul.f32 2.0, %v654_v43  ;;  %v1618_v61 = vpop.eup %1617 }
  0xfd   : > { %v750_v53 = vadd.f32 1.0, %v686_v47  ;;  %v782_v54 = vadd.f32 %v686_v47, %v654_v43  ;;  %v702_v56 = vmul.f32 2.0, %v1614_v39  ;;  %v862_v58 = vmul.f32 2.0, %v670_v48  ;;  %v1620_v7 = vpop.eup %1619 }
  0xfe   : > { %v928_v62 = vadd.f32 %v896_v52, %v1986_v51  ;;  %v657_v0 = vmul.f32 %v1616_v49, %v1616_v49  ;;  %v689_v1 = vmul.f32 2.0, %v1616_v49  ;;  %1633 = vrcp.f32 %v912_v50  ;;  %v1622_v14 = vpop.eup %1621 }
  0xff   : > { %v1994_v63 = vsel %vm718_vm4, %v750_v53, %v782_v54  ;;  %v878_v2 = vsel %vm718_vm4, %v846_v55, 2.0  ;;  %v766_v3 = vadd.f32 1.0, %v702_v56  ;;  %v798_v5 = vadd.f32 %v702_v56, %v670_v48  ;;  %v1624_v19 = vpop.eup %1623 }
 0x100   : > { %v910_v9 = vadd.f32 %v878_v2, %v1994_v63  ;;  %v894_v10 = vsel %vm734_vm5, %v862_v58, 2.0  ;;  %v753_v12 = vadd.f32 1.0, %v689_v1  ;;  %v785_v13 = vadd.f32 %v689_v1, %v657_v0  ;;  %v1626_v26 = vpop.eup %1625 }
 0x101   : > { %v2004_v15 = vsel %vm734_vm5, %v766_v3, %v798_v5  ;;  %v849_v16 = vmul.f32 2.0, %v657_v0  ;;  %v673_v17 = vmul.f32 %v1618_v61, %v1618_v61  ;;  %v705_v18 = vmul.f32 2.0, %v1618_v61  ;;  %v1628_v50 = vpop.eup %1627  ;;  %v418_v3 = vpop.f32.mrf.mxu0 }
 0x102   : > { %1635 = vrcp.f32 %v928_v62  ;;  %v926_v21 = vadd.f32 %v894_v10, %v2004_v15  ;;  %v2009_v22 = vsel %vm721_vm6, %v753_v12, %v785_v13  ;;  %v655_v34 = vmul.f32 %v1620_v7, %v1620_v7  ;;  %v482_v5 = vpop.f32.mrf.mxu1 }
 0x103   : > { %1637 = vrcp.f32 %v910_v9  ;;  %v881_v27 = vsel %vm721_vm6, %v849_v16, 2.0  ;;  %v769_v28 = vadd.f32 1.0, %v705_v18  ;;  %v801_v31 = vadd.f32 %v705_v18, %v673_v17  ;;  %v1630_v56 = vpop.eup %1629 }
 0x104   : > { %1639 = vrcp.f32 %v926_v21  ;;  %v913_v32 = vadd.f32 %v881_v27, %v2009_v22  ;;  %v865_v33 = vmul.f32 2.0, %v673_v17  ;;  %v687_v38 = vmul.f32 2.0, %v1620_v7  ;;  %v1632_v62 = vpop.eup %1631 }
 0x105   : > { %v833_v37 = vsel %vm737_vm7, %v769_v28, %v801_v31  ;;  %v671_v39 = vmul.f32 %v1622_v14, %v1622_v14  ;;  %v703_v40 = vmul.f32 2.0, %v1622_v14  ;;  %v847_v42 = vmul.f32 2.0, %v655_v34 }
 0x106   : > { %1641 = vrcp.f32 %v913_v32  ;;  %v897_v41 = vsel %vm737_vm7, %v865_v33, 2.0  ;;  %v549_v43 = vand.u32 2147483647, %v2012_v25  ;;  %v751_v47 = vadd.f32 1.0, %v687_v38 }
 0x107   : > { %v929_v46 = vadd.f32 %v897_v41, %v833_v37  ;;  %v783_v48 = vadd.f32 %v687_v38, %v655_v34  ;;  %v767_v49 = vadd.f32 1.0, %v703_v40  ;;  %v879_v52 = vsel %vm719_vm8, %v847_v42, 2.0 }
 0x108   : > { %v799_v53 = vadd.f32 %v703_v40, %v671_v39  ;;  %v863_v54 = vmul.f32 2.0, %v671_v39  ;;  %v660_v55 = vmul.f32 %v1624_v19, %v1624_v19  ;;  %v692_v61 = vmul.f32 2.0, %v1624_v19 }
 0x109   : > { %1643 = vrcp.f32 %v929_v46  ;;  %v815_v58 = vsel %vm719_vm8, %v751_v47, %v783_v48  ;;  %v676_v9 = vmul.f32 %v1626_v26, %v1626_v26  ;;  %v581_v10 = vsub.f32 0.0, %v549_v43 }
 0x10a   : > { %v911_v0 = vadd.f32 %v879_v52, %v815_v58  ;;  %v831_v1 = vsel %vm735_vm9, %v767_v49, %v799_v53  ;;  %v895_v2 = vsel %vm735_vm9, %v863_v54, 2.0  ;;  %v756_v7 = vadd.f32 1.0, %v692_v61  ;;  %v1517_v53 = vpop.f32.mrf.mxu0 }
 0x10b   : > { %v927_v6 = vadd.f32 %v895_v2, %v831_v1  ;;  %v1634_v12 = vpop.eup %1633  ;;  %v788_v13 = vadd.f32 %v692_v61, %v660_v55  ;;  %v852_v14 = vmul.f32 2.0, %v660_v55  ;;  %v708_v16 = vmul.f32 2.0, %v1626_v26 }
 0x10c   : > { %1645 = vrcp.f32 %v911_v0  ;;  %v2031_v17 = vadd.f32 %v1918_v20, %v418_v3  ;;  %v2034_v18 = vadd.f32 %v1918_v20, %v482_v5  ;;  %v658_v27 = vmul.f32 %v1628_v50, %v1628_v50  ;;  %v1533_v3 = vpop.f32.mrf.mxu1 }
 0x10d   : > { %1647 = vrcp.f32 %v927_v6  ;;  %v2038_v19 = vsel %vm724_vm10, %v756_v7, %v788_v13  ;;  %v884_v21 = vsel %vm724_vm10, %v852_v14, 2.0  ;;  %v690_v28 = vmul.f32 2.0, %v1628_v50 }
 0x10e   : > { %v944_v26 = vmul.f32 %v1979_v45, %v1921_v23  ;;  %v960_v32 = vmul.f32 %v1986_v51, %v1924_v24  ;;  %v868_v33 = vmul.f32 2.0, %v676_v9  ;;  %v636_v34 = vmul.f32 1.442695, %v581_v10 }
 0x10f   : > { %v1636_v31 = vpop.eup %1635  ;;  %v942_v39 = vmul.f32 %v1994_v63, %v1929_v29  ;;  %v916_v40 = vadd.f32 %v884_v21, %v2038_v19  ;;  %v772_v41 = vadd.f32 1.0, %v708_v16  ;;  %v804_v42 = vadd.f32 %v708_v16, %v676_v9  ;;  %v431_v16 = vpop.f32.mrf.mxu0 }
 0x110   : > { %v1638_v38 = vpop.eup %1637  ;;  %v958_v23 = vmul.f32 %v2004_v15, %v1932_v30  ;;  %v945_v24 = vmul.f32 %v2009_v22, %v1935_v35  ;;  %v961_v45 = vmul.f32 %v833_v37, %v1938_v36  ;;  %v943_v51 = vmul.f32 %v815_v58, %v1944_v44 }
 0x111   : > { %v1640_v43 = vpop.eup %1639  ;;  %v1008_v46 = vmul.f32 %v1634_v12, %v944_v26  ;;  %v754_v29 = vadd.f32 1.0, %v690_v28  ;;  %v786_v63 = vadd.f32 %v690_v28, %v658_v27  ;;  %v850_v47 = vmul.f32 2.0, %v658_v27 }
 0x112   : > { %v1024_v49 = vmul.f32 %v1636_v31, %v960_v32  ;;  %v959_v50 = vmul.f32 %v831_v1, %v1949_v57  ;;  %v900_v30 = vsel %vm740_vm11, %v868_v33, 2.0  ;;  %v674_v15 = vmul.f32 %v1630_v56, %v1630_v56 }
 0x113   : > { %v1642_v48 = vpop.eup %1641  ;;  %1649 = vrcp.f32 %v916_v40  ;;  %v2064_v35 = vsel %vm740_vm11, %v772_v41, %v804_v42  ;;  %v706_v36 = vmul.f32 2.0, %v1630_v56  ;;  %v1006_v44 = vmul.f32 %v1638_v38, %v942_v39  ;;  %v495_v39 = vpop.f32.mrf.mxu1 }
 0x114   : > { %v1009_v52 = vmul.f32 %v1642_v48, %v945_v24  ;;  %v661_v22 = vmul.f32 %v1632_v62, %v1632_v62  ;;  %v693_v37 = vmul.f32 2.0, %v1632_v62  ;;  %1651 = vpow2.f32 %v636_v34 }
 0x115   : > { %v1022_v57 = vmul.f32 %v1640_v43, %v958_v23  ;;  %v2069_v58 = vsel %vm722_vm12, %v754_v29, %v786_v63  ;;  %v882_v61 = vsel %vm722_vm12, %v850_v47, 2.0  ;;  %v932_v56 = vadd.f32 %v900_v30, %v2064_v35 }
 0x116   : > { %v1644_v54 = vpop.eup %1643  ;;  %v1395_v55 = vpack.c.bf16 %v1009_v52, %v1008_v46  ;;  %v757_v1 = vadd.f32 1.0, %v693_v37  ;;  %v789_v2 = vadd.f32 %v693_v37, %v661_v22  ;;  %v770_v62 = vadd.f32 1.0, %v706_v36 }
 0x117   : > { %v1025_v0 = vmul.f32 %v1644_v54, %v961_v45  ;;  %v853_v5 = vmul.f32 2.0, %v661_v22  ;;  %v531_v6 = vand.u32 2147483647, %v2031_v17  ;;  %v547_v7 = vand.u32 2147483647, %v2034_v18 }
 0x118   : > { %1467 = vst [vmem:[%s2074_s17 + $0x8] sm:$0xff] %v1395_v55   ;;  %v914_v12 = vadd.f32 %v882_v61, %v2069_v58  ;;  %v802_v13 = vadd.f32 %v706_v36, %v674_v15  ;;  %v2082_v14 = vsel %vm725_vm13, %v757_v1, %v789_v2  ;;  %v866_v28 = vmul.f32 2.0, %v674_v15 }
 0x119   : > { %v1646_v9 = vpop.eup %1645  ;;  %v1435_v10 = vpack.c.bf16 %v1025_v0, %v1024_v49  ;;  %v885_v31 = vsel %vm725_vm13, %v853_v5, 2.0  ;;  %v563_v26 = vsub.f32 0.0, %v531_v6  ;;  %v579_v34 = vsub.f32 0.0, %v547_v7  ;;  %v1534_v49 = vpop.f32.mrf.mxu1 }
 0x11a   : > { %v1648_v21 = vpop.eup %1647  ;;  %v1007_v27 = vmul.f32 %v1646_v9, %v943_v51  ;;  %v917_v33 = vadd.f32 %v885_v31, %v2082_v14  ;;  %v2089_v38 = vadd.f32 %v1517_v53, %v1918_v20  ;;  %v2092_v42 = vadd.f32 %v1533_v3, %v1918_v20  ;;  %v1518_v51 = vpop.f32.mrf.mxu0 }
 0x11b   : > { %1475 = vst [vmem:[%s2074_s17 + $0x48] sm:$0xff] %v1435_v10   ;;  %v1023_v32 = vmul.f32 %v1648_v21, %v959_v50  ;;  %v600_v41 = vmul.f32 1.442695, %v563_v26  ;;  %v2095_v43 = vadd.f32 %v1918_v20, %v431_v16  ;;  %v632_v24 = vmul.f32 1.442695, %v579_v34 }
 0x11c   : > { %v1390_v40 = vpack.c.bf16 %v1007_v27, %v1006_v44  ;;  %1653 = vrcp.f32 %v917_v33  ;;  %v536_v45 = vand.u32 2147483647, %v2089_v38  ;;  %v834_v46 = vsel %vm738_vm14, %v770_v62, %v802_v13  ;;  %v434_v22 = vpop.f32.mrf.mxu0 }
 0x11d   : > { %v1430_v23 = vpack.c.bf16 %v1023_v32, %v1022_v57  ;;  %1655 = vpow2.f32 %v600_v41  ;;  %v552_v29 = vand.u32 2147483647, %v2092_v42  ;;  %v898_v63 = vsel %vm738_vm14, %v866_v28, 2.0 }
 0x11e   : > { %1391 = vst [vmem:[%s2074_s17] sm:$0xff] %v1390_v40   ;;  %1657 = vpow2.f32 %v632_v24  ;;  %v568_v47 = vsub.f32 0.0, %v536_v45  ;;  %v534_v48 = vand.u32 2147483647, %v2095_v43  ;;  %v2107_v30 = vadd.f32 %v1918_v20, %v495_v39 }
 0x11f   : > { %1474 = vst [vmem:[%s2074_s17 + $0x40] sm:$0xff] %v1430_v23   ;;  %1659 = vrcp.f32 %v932_v56  ;;  %v584_v50 = vsub.f32 0.0, %v552_v29  ;;  %v2110_v15 = vadd.f32 %v1518_v51, %v1918_v20  ;;  %vm741_vm15 = vcmp.ge.f32.partialorder %v2012_v25, 0.0 }
 0x120   : > { %v1650_v52 = vpop.eup %1649  ;;  %1661 = vrcp.f32 %v914_v12  ;;  %v610_v36 = vmul.f32 1.442695, %v568_v47  ;;  %v566_v44 = vsub.f32 0.0, %v534_v48  ;;  %v930_v53 = vadd.f32 %v898_v63, %v834_v46 }
 0x121   : > { %v1652_v37 = vpop.eup %1651  ;;  %v642_v54 = vmul.f32 1.442695, %v584_v50  ;;  %v550_v57 = vand.u32 2147483647, %v2107_v30  ;;  %v2115_v55 = vadd.f32 %v1534_v49, %v1918_v20  ;;  %v537_v2 = vand.u32 2147483647, %v2110_v15  ;;  %v498_v49 = vpop.f32.mrf.mxu1 }
 0x122   : > { %v677_v61 = vmul.f32 %v1652_v37, %v1652_v37  ;;  %v709_v0 = vmul.f32 2.0, %v1652_v37  ;;  %1663 = vpow2.f32 %v610_v36  ;;  %v606_v56 = vmul.f32 1.442695, %v566_v44 }
 0x123   : > { %1665 = vpow2.f32 %v642_v54  ;;  %v582_v1 = vsub.f32 0.0, %v550_v57  ;;  %v2119_v3 = vadd.f32 %v1918_v20, %v434_v22  ;;  %v569_v9 = vsub.f32 0.0, %v537_v2 }
 0x124   : > { %v773_v62 = vadd.f32 1.0, %v709_v0  ;;  %v805_v5 = vadd.f32 %v709_v0, %v677_v61  ;;  %v869_v6 = vmul.f32 2.0, %v677_v61  ;;  %1667 = vpow2.f32 %v606_v56 }
 0x125   : > { %1669 = vrcp.f32 %v930_v53  ;;  %v638_v7 = vmul.f32 1.442695, %v582_v1  ;;  %v553_v10 = vand.u32 2147483647, %v2115_v55  ;;  %v948_v16 = vmul.f32 %v2038_v19, %v1952_v59 }
 0x126   : > { %v2124_v12 = vsel %vm741_vm15, %v773_v62, %v805_v5  ;;  %v901_v13 = vsel %vm741_vm15, %v869_v6, 2.0  ;;  %v964_v21 = vmul.f32 %v2064_v35, %v1955_v60  ;;  %v612_v28 = vmul.f32 1.442695, %v569_v9  ;;  %v1521_v62 = vpop.f32.mrf.mxu0 }
 0x127   : > { %v933_v27 = vadd.f32 %v901_v13, %v2124_v12  ;;  %v949_v31 = vmul.f32 %v2082_v14, %v1968_v11  ;;  %1671 = vpow2.f32 %v638_v7  ;;  %v585_v26 = vsub.f32 0.0, %v553_v10 }
 0x128   : > { %v535_v32 = vand.u32 2147483647, %v2119_v3  ;;  %v1012_v34 = vmul.f32 %v1650_v52, %v948_v16  ;;  %v946_v39 = vmul.f32 %v2069_v58, %v1961_v4  ;;  %v962_v59 = vmul.f32 %v834_v46, %v1964_v8 }
 0x129   : > { %v1654_v33 = vpop.eup %1653  ;;  %1673 = vrcp.f32 %v933_v27  ;;  %v644_v35 = vmul.f32 1.442695, %v585_v26  ;;  %vm723_vm0 = vcmp.ge.f32.partialorder %v2031_v17, 0.0  ;;  %vm739_vm1 = vcmp.ge.f32.partialorder %v2034_v18, 0.0  ;;  %v1537_v26 = vpop.f32.mrf.mxu1 }
 0x12a   : > { %v1656_v19 = vpop.eup %1655  ;;  %v1013_v60 = vmul.f32 %v1654_v33, %v949_v31  ;;  %1675 = vpow2.f32 %v612_v28  ;;  %v567_v40 = vsub.f32 0.0, %v535_v32  ;;  %vm728_vm2 = vcmp.ge.f32.partialorder %v2089_v38, 0.0 }
 0x12b   : > { %v1658_v41 = vpop.eup %1657  ;;  %v659_v11 = vmul.f32 %v1656_v19, %v1656_v19  ;;  %v691_v14 = vmul.f32 2.0, %v1656_v19  ;;  %1677 = vpow2.f32 %v644_v35  ;;  %vm744_vm3 = vcmp.ge.f32.partialorder %v2092_v42, 0.0 }
 0x12c   : > { %v1660_v23 = vpop.eup %1659  ;;  %v1405_v24 = vpack.c.bf16 %v1013_v60, %v1012_v34  ;;  %v675_v45 = vmul.f32 %v1658_v41, %v1658_v41  ;;  %v707_v4 = vmul.f32 2.0, %v1658_v41  ;;  %v608_v29 = vmul.f32 1.442695, %v567_v40  ;;  %v447_v60 = vpop.f32.mrf.mxu0 }
 0x12d   : > { %v1662_v8 = vpop.eup %1661  ;;  %v755_v58 = vadd.f32 1.0, %v691_v14  ;;  %v787_v51 = vadd.f32 %v691_v14, %v659_v11  ;;  %v851_v46 = vmul.f32 2.0, %v659_v11  ;;  %v1028_v52 = vmul.f32 %v1660_v23, %v964_v21 }
 0x12e   : > { %1469 = vst [vmem:[%s2074_s17 + $0x18] sm:$0xff] %v1405_v24   ;;  %v771_v63 = vadd.f32 1.0, %v707_v4  ;;  %v803_v47 = vadd.f32 %v707_v4, %v675_v45  ;;  %v867_v48 = vmul.f32 2.0, %v675_v45  ;;  %1679 = vpow2.f32 %v608_v29 }
 0x12f   : > { %v1664_v50 = vpop.eup %1663  ;;  %v819_v36 = vsel %vm723_vm0, %v755_v58, %v787_v51  ;;  %v883_v44 = vsel %vm723_vm0, %v851_v46, 2.0  ;;  %v2148_v37 = vmul.f32 %v1662_v8, %v946_v39  ;;  %v2155_v2 = vadd.f32 %v1918_v20, %v498_v49 }
 0x130   : > { %v1666_v22 = vpop.eup %1665  ;;  %v915_v53 = vadd.f32 %v883_v44, %v819_v36  ;;  %v835_v54 = vsel %vm739_vm1, %v771_v63, %v803_v47  ;;  %v899_v57 = vsel %vm739_vm1, %v867_v48, 2.0  ;;  %v664_v56 = vmul.f32 %v1664_v50, %v1664_v50 }
 0x131   : > { %v1668_v61 = vpop.eup %1667  ;;  %v931_v0 = vadd.f32 %v899_v57, %v835_v54  ;;  %v696_v1 = vmul.f32 2.0, %v1664_v50  ;;  %v680_v6 = vmul.f32 %v1666_v22, %v1666_v22  ;;  %v712_v7 = vmul.f32 2.0, %v1666_v22 }
 0x132   : > { %v1670_v5 = vpop.eup %1669  ;;  %1681 = vrcp.f32 %v915_v53  ;;  %v662_v9 = vmul.f32 %v1668_v61, %v1668_v61  ;;  %vm726_vm4 = vcmp.ge.f32.partialorder %v2095_v43, 0.0  ;;  %v856_v16 = vmul.f32 2.0, %v664_v56 }
 0x133   : > { %1683 = vrcp.f32 %v931_v0  ;;  %v760_v10 = vadd.f32 1.0, %v696_v1  ;;  %v792_v13 = vadd.f32 %v696_v1, %v664_v56  ;;  %v776_v21 = vadd.f32 1.0, %v712_v7 }
 0x134   : > { %v808_v27 = vadd.f32 %v712_v7, %v680_v6  ;;  %v872_v28 = vmul.f32 2.0, %v680_v6  ;;  %v694_v31 = vmul.f32 2.0, %v1668_v61  ;;  %vm729_vm5 = vcmp.ge.f32.partialorder %v2110_v15, 0.0  ;;  %v1672_v32 = vpop.eup %1671 }
 0x135   : > { %v2159_v33 = vmul.f32 %v1670_v5, %v962_v59  ;;  %v965_v34 = vmul.f32 %v2124_v12, %v2012_v25  ;;  %v2165_v39 = vsel %vm728_vm2, %v760_v10, %v792_v13  ;;  %v888_v19 = vsel %vm728_vm2, %v856_v16, 2.0 }
 0x136   : > { %v1674_v35 = vpop.eup %1673  ;;  %v2171_v40 = vsel %vm744_vm3, %v776_v21, %v808_v27  ;;  %v904_v59 = vsel %vm744_vm3, %v872_v28, 2.0  ;;  %v551_v41 = vand.u32 2147483647, %v2155_v2  ;;  %v2177_v25 = vadd.f32 %v1521_v62, %v1918_v20  ;;  %v511_v21 = vpop.f32.mrf.mxu1 }
 0x137   : > { %v1676_v12 = vpop.eup %1675  ;;  %v1029_v11 = vmul.f32 %v1674_v35, %v965_v34  ;;  %v920_v14 = vadd.f32 %v888_v19, %v2165_v39  ;;  %v854_v23 = vmul.f32 2.0, %v662_v9  ;;  %vm745_vm6 = vcmp.ge.f32.partialorder %v2115_v55, 0.0 }
 0x138   : > { %v2182_v24 = vadd.f32 %v1537_v26, %v1918_v20  ;;  %v758_v45 = vadd.f32 1.0, %v694_v31  ;;  %v790_v4 = vadd.f32 %v694_v31, %v662_v9  ;;  %v678_v8 = vmul.f32 %v1672_v32, %v1672_v32  ;;  %v1678_v51 = vpop.eup %1677 }
 0x139   : > { %v2185_v58 = vadd.f32 %v1918_v20, %v447_v60  ;;  %v1445_v46 = vpack.c.bf16 %v1029_v11, %v1028_v52  ;;  %v936_v29 = vadd.f32 %v904_v59, %v2171_v40  ;;  %v710_v63 = vmul.f32 2.0, %v1672_v32  ;;  %v1522_v11 = vpop.f32.mrf.mxu0 }
 0x13a   : > { %v665_v47 = vmul.f32 %v1676_v12, %v1676_v12  ;;  %v947_v48 = vmul.f32 %v819_v36, %v2031_v17  ;;  %v697_v49 = vmul.f32 2.0, %v1676_v12  ;;  %vm727_vm7 = vcmp.ge.f32.partialorder %v2119_v3, 0.0 }
 0x13b   : > { %v583_v50 = vsub.f32 0.0, %v551_v41  ;;  %v540_v44 = vand.u32 2147483647, %v2177_v25  ;;  %1477 = vst [vmem:[%s2074_s17 + $0x58] sm:$0xff] %v1445_v46   ;;  %v963_v22 = vmul.f32 %v835_v54, %v2034_v18  ;;  %1685 = vrcp.f32 %v920_v14  ;;  %v1680_v57 = vpop.eup %1679 }
 0x13c   : > { %v886_v53 = vsel %vm726_vm4, %v854_v23, 2.0  ;;  %v857_v52 = vmul.f32 2.0, %v665_v47  ;;  %v2197_v61 = vsel %vm726_vm4, %v758_v45, %v790_v4  ;;  %v761_v17 = vadd.f32 1.0, %v697_v49  ;;  %v1538_v4 = vpop.f32.mrf.mxu1 }
 0x13d   : > { %v793_v36 = vadd.f32 %v697_v49, %v665_v47  ;;  %v681_v0 = vmul.f32 %v1678_v51, %v1678_v51  ;;  %1687 = vrcp.f32 %v936_v29  ;;  %v774_v56 = vadd.f32 1.0, %v710_v63 }
 0x13e   : > { %v870_v1 = vmul.f32 2.0, %v678_v8  ;;  %v889_v62 = vsel %vm729_vm5, %v857_v52, 2.0  ;;  %v713_v54 = vmul.f32 2.0, %v1678_v51  ;;  %v663_v6 = vmul.f32 %v1680_v57, %v1680_v57 }
 0x13f   : > { %v2203_v18 = vsel %vm729_vm5, %v761_v17, %v793_v36  ;;  %v873_v5 = vmul.f32 2.0, %v681_v0  ;;  %v1682_v7 = vpop.eup %1681  ;;  %v918_v9 = vadd.f32 %v886_v53, %v2197_v61  ;;  %v806_v10 = vadd.f32 %v710_v63, %v678_v8  ;;  %v450_v63 = vpop.f32.mrf.mxu0 }
 0x140   : > { %v921_v13 = vadd.f32 %v889_v62, %v2203_v18  ;;  %v695_v16 = vmul.f32 2.0, %v1680_v57  ;;  %v1684_v27 = vpop.eup %1683  ;;  %v1011_v28 = vmul.f32 %v1682_v7, %v947_v48  ;;  %v777_v31 = vadd.f32 1.0, %v713_v54 }
 0x141   : > { %v809_v26 = vadd.f32 %v713_v54, %v681_v0  ;;  %v905_v32 = vsel %vm745_vm6, %v873_v5, 2.0  ;;  %v1027_v34 = vmul.f32 %v1684_v27, %v963_v22  ;;  %v855_v41 = vmul.f32 2.0, %v663_v6 }
 0x142   : > { %1689 = vrcp.f32 %v921_v13  ;;  %v759_v19 = vadd.f32 1.0, %v695_v16  ;;  %v791_v60 = vadd.f32 %v695_v16, %v663_v6  ;;  %v1400_v35 = vpack.c.bf16 %v1011_v28, %v2148_v37 }
 0x143   : > { %v2212_v59 = vsel %vm745_vm6, %v777_v31, %v809_v26  ;;  %v640_v12 = vmul.f32 1.442695, %v583_v50  ;;  %v1440_v14 = vpack.c.bf16 %v1027_v34, %v2159_v33  ;;  %1691 = vrcp.f32 %v918_v9  ;;  %v514_v50 = vpop.f32.mrf.mxu1 }
 0x144   : > { %v937_v23 = vadd.f32 %v905_v32, %v2212_v59  ;;  %v2218_v45 = vsel %vm727_vm7, %v759_v19, %v791_v60  ;;  %1468 = vst [vmem:[%s2074_s17 + $0x10] sm:$0xff] %v1400_v35   ;;  %v887_v37 = vsel %vm727_vm7, %v855_v41, 2.0  ;;  %v572_v8 = vsub.f32 0.0, %v540_v44 }
 0x145   : > { %1693 = vpow2.f32 %v640_v12  ;;  %1476 = vst [vmem:[%s2074_s17 + $0x50] sm:$0xff] %v1440_v14   ;;  %v919_v51 = vadd.f32 %v887_v37, %v2218_v45  ;;  %v556_v33 = vand.u32 2147483647, %v2182_v24  ;;  %vm742_vm8 = vcmp.ge.f32.partialorder %v2107_v30, 0.0 }
 0x146   : > { %1695 = vrcp.f32 %v937_v23  ;;  %v618_v46 = vmul.f32 1.442695, %v572_v8  ;;  %v538_v29 = vand.u32 2147483647, %v2185_v58  ;;  %v2228_v47 = vsel %vm742_vm8, %v774_v56, %v806_v10 }
 0x147   : > { %v902_v48 = vsel %vm742_vm8, %v870_v1, 2.0  ;;  %1697 = vrcp.f32 %v919_v51  ;;  %v588_v49 = vsub.f32 0.0, %v556_v33  ;;  %v2231_v53 = vadd.f32 %v1918_v20, %v511_v21 }
 0x148   : > { %v1686_v22 = vpop.eup %1685  ;;  %1699 = vpow2.f32 %v618_v46  ;;  %v570_v44 = vsub.f32 0.0, %v538_v29  ;;  %v2234_v52 = vadd.f32 %v1522_v11, %v1918_v20  ;;  %v2237_v17 = vadd.f32 %v1538_v4, %v1918_v20 }
 0x149   : > { %v650_v57 = vmul.f32 1.442695, %v588_v49  ;;  %v2240_v36 = vadd.f32 %v1918_v20, %v450_v63  ;;  %v934_v56 = vadd.f32 %v902_v48, %v2228_v47  ;;  %v554_v62 = vand.u32 2147483647, %v2231_v53 }
 0x14a   : > { %v1688_v0 = vpop.eup %1687  ;;  %v614_v1 = vmul.f32 1.442695, %v570_v44  ;;  %v2245_v54 = vadd.f32 %v1918_v20, %v514_v50  ;;  %v541_v5 = vand.u32 2147483647, %v2234_v52  ;;  %v557_v6 = vand.u32 2147483647, %v2237_v17 }
 0x14b   : > { %1701 = vpow2.f32 %v650_v57  ;;  %v586_v7 = vsub.f32 0.0, %v554_v62  ;;  %v539_v9 = vand.u32 2147483647, %v2240_v36  ;;  %v952_v10 = vmul.f32 %v2165_v39, %v2089_v38 }
 0x14c   : > { %1703 = vpow2.f32 %v614_v1  ;;  %v953_v13 = vmul.f32 %v2203_v18, %v2110_v15  ;;  %v573_v16 = vsub.f32 0.0, %v541_v5  ;;  %v589_v21 = vsub.f32 0.0, %v557_v6 }
 0x14d   : > { %1705 = vrcp.f32 %v934_v56  ;;  %v646_v20 = vmul.f32 1.442695, %v586_v7  ;;  %v571_v28 = vsub.f32 0.0, %v539_v9  ;;  %v555_v31 = vand.u32 2147483647, %v2245_v54 }
 0x14e   : > { %v1016_v26 = vmul.f32 %v1686_v22, %v952_v10  ;;  %v620_v34 = vmul.f32 1.442695, %v573_v16  ;;  %v652_v19 = vmul.f32 1.442695, %v589_v21  ;;  %v968_v15 = vmul.f32 %v2171_v40, %v2092_v42 }
 0x14f   : > { %v1690_v27 = vpop.eup %1689  ;;  %1707 = vpow2.f32 %v646_v20  ;;  %v616_v35 = vmul.f32 1.442695, %v571_v28  ;;  %v587_v38 = vsub.f32 0.0, %v555_v31  ;;  %v969_v41 = vmul.f32 %v2212_v59, %v2115_v55 }
 0x150   : > { %v1017_v32 = vmul.f32 %v1690_v27, %v953_v13  ;;  %v1692_v60 = vpop.eup %1691  ;;  %1709 = vpow2.f32 %v620_v34  ;;  %v950_v11 = vmul.f32 %v2197_v61, %v2095_v43  ;;  %v1032_v4 = vmul.f32 %v1688_v0, %v968_v15 }
 0x151   : > { %1711 = vpow2.f32 %v652_v19  ;;  %v951_v8 = vmul.f32 %v2218_v45, %v2119_v3  ;;  %v648_v42 = vmul.f32 1.442695, %v587_v38  ;;  %vm743_vm9 = vcmp.ge.f32.partialorder %v2155_v2, 0.0 }
 0x152   : > { %v1694_v39 = vpop.eup %1693  ;;  %v1415_v18 = vpack.c.bf16 %v1017_v32, %v1016_v26  ;;  %1713 = vpow2.f32 %v616_v35  ;;  %v1014_v46 = vmul.f32 %v1692_v60, %v950_v11  ;;  %v966_v7 = vmul.f32 %v2228_v47, %v2107_v30 }
 0x153   : > { %v1696_v12 = vpop.eup %1695  ;;  %v679_v14 = vmul.f32 %v1694_v39, %v1694_v39  ;;  %v711_v23 = vmul.f32 2.0, %v1694_v39  ;;  %1715 = vpow2.f32 %v648_v42  ;;  %vm732_vm10 = vcmp.ge.f32.partialorder %v2177_v25, 0.0 }
 0x154   : > { %1471 = vst [vmem:[%s2074_s17 + $0x28] sm:$0xff] %v1415_v18   ;;  %v1033_v37 = vmul.f32 %v1696_v12, %v969_v41  ;;  %v1698_v40 = vpop.eup %1697  ;;  %vm748_vm11 = vcmp.ge.f32.partialorder %v2182_v24, 0.0  ;;  %vm730_vm12 = vcmp.ge.f32.partialorder %v2185_v58, 0.0  ;;  %vm733_vm13 = vcmp.ge.f32.partialorder %v2234_v52, 0.0 }
 0x155   : > { %v775_v51 = vadd.f32 1.0, %v711_v23  ;;  %v807_v33 = vadd.f32 %v711_v23, %v679_v14  ;;  %v871_v55 = vmul.f32 2.0, %v679_v14  ;;  %v1700_v59 = vpop.eup %1699  ;;  %v1015_v61 = vmul.f32 %v1698_v40, %v951_v8 }
 0x156   : > { %v1455_v43 = vpack.c.bf16 %v1033_v37, %v1032_v4  ;;  %v668_v48 = vmul.f32 %v1700_v59, %v1700_v59  ;;  %v700_v49 = vmul.f32 2.0, %v1700_v59  ;;  %vm746_vm14 = vcmp.ge.f32.partialorder %v2231_v53, 0.0 }
 0x157   : > { %v839_v29 = vsel %vm743_vm9, %v775_v51, %v807_v33  ;;  %v903_v63 = vsel %vm743_vm9, %v871_v55, 2.0  ;;  %v1410_v3 = vpack.c.bf16 %v1015_v61, %v1014_v46  ;;  %vm749_vm15 = vcmp.ge.f32.partialorder %v2237_v17, 0.0 }
 0x158   : > { %1479 = vst [vmem:[%s2074_s17 + $0x68] sm:$0xff] %v1455_v43   ;;  %v935_v45 = vadd.f32 %v903_v63, %v839_v29  ;;  %v1702_v50 = vpop.eup %1701  ;;  %v764_v44 = vadd.f32 1.0, %v700_v49  ;;  %v796_v56 = vadd.f32 %v700_v49, %v668_v48  ;;  %v860_v1 = vmul.f32 2.0, %v668_v48 }
 0x159   : > { %v1704_v22 = vpop.eup %1703  ;;  %1470 = vst [vmem:[%s2074_s17 + $0x20] sm:$0xff] %v1410_v3   ;;  %v684_v57 = vmul.f32 %v1702_v50, %v1702_v50  ;;  %v716_v0 = vmul.f32 2.0, %v1702_v50  ;;  %v967_v32 = vmul.f32 %v839_v29, %v2155_v2  ;;  %vm731_vm0 = vcmp.ge.f32.partialorder %v2240_v36, 0.0 }
 0x15a   : > { %1717 = vrcp.f32 %v935_v45  ;;  %v666_v62 = vmul.f32 %v1704_v22, %v1704_v22  ;;  %v698_v5 = vmul.f32 2.0, %v1704_v22  ;;  %v1706_v6 = vpop.eup %1705  ;;  %v2273_v26 = vsel %vm732_vm10, %v764_v44, %v796_v56 }
 0x15b   : > { %v780_v9 = vadd.f32 1.0, %v716_v0  ;;  %v812_v10 = vadd.f32 %v716_v0, %v684_v57  ;;  %v876_v13 = vmul.f32 2.0, %v684_v57  ;;  %v1030_v31 = vmul.f32 %v1706_v6, %v966_v7 }
 0x15c   : > { %v1708_v16 = vpop.eup %1707  ;;  %v762_v21 = vadd.f32 1.0, %v698_v5  ;;  %v794_v27 = vadd.f32 %v698_v5, %v666_v62  ;;  %v858_v20 = vmul.f32 2.0, %v666_v62  ;;  %v892_v30 = vsel %vm732_vm10, %v860_v1, 2.0 }
 0x15d   : > { %v1710_v28 = vpop.eup %1709  ;;  %v2280_v34 = vsel %vm748_vm11, %v780_v9, %v812_v10  ;;  %v908_v19 = vsel %vm748_vm11, %v876_v13, 2.0  ;;  %v682_v60 = vmul.f32 %v1708_v16, %v1708_v16  ;;  %v714_v35 = vmul.f32 2.0, %v1708_v16 }
 0x15e   : > { %v1712_v47 = vpop.eup %1711  ;;  %v669_v38 = vmul.f32 %v1710_v28, %v1710_v28  ;;  %v701_v39 = vmul.f32 2.0, %v1710_v28  ;;  %v924_v41 = vadd.f32 %v892_v30, %v2273_v26  ;;  %v2287_v12 = vsel %vm730_vm12, %v762_v21, %v794_v27 }
 0x15f   : > { %v685_v15 = vmul.f32 %v1712_v47, %v1712_v47  ;;  %v1714_v18 = vpop.eup %1713  ;;  %v890_v2 = vsel %vm730_vm12, %v858_v20, 2.0  ;;  %v717_v11 = vmul.f32 2.0, %v1712_v47  ;;  %v940_v14 = vadd.f32 %v908_v19, %v2280_v34 }
 0x160   : > { %v778_v23 = vadd.f32 1.0, %v714_v35  ;;  %v874_v4 = vmul.f32 2.0, %v682_v60  ;;  %v765_v37 = vadd.f32 1.0, %v701_v39  ;;  %v810_v8 = vadd.f32 %v714_v35, %v682_v60  ;;  %v1716_v43 = vpop.eup %1715 }
 0x161   : > { %v797_v42 = vadd.f32 %v701_v39, %v669_v38  ;;  %v861_v40 = vmul.f32 2.0, %v669_v38  ;;  %v781_v51 = vadd.f32 1.0, %v717_v11  ;;  %v813_v33 = vadd.f32 %v717_v11, %v685_v15 }
 0x162   : > { %v877_v55 = vmul.f32 2.0, %v685_v15  ;;  %v667_v59 = vmul.f32 %v1714_v18, %v1714_v18  ;;  %v699_v46 = vmul.f32 2.0, %v1714_v18  ;;  %1719 = vrcp.f32 %v924_v41 }
 0x163   : > { %v922_v61 = vadd.f32 %v890_v2, %v2287_v12  ;;  %v829_v29 = vsel %vm733_vm13, %v765_v37, %v797_v42  ;;  %v893_v63 = vsel %vm733_vm13, %v861_v40, 2.0  ;;  %1721 = vrcp.f32 %v940_v14 }
 0x164   : > { %v925_v49 = vadd.f32 %v893_v63, %v829_v29  ;;  %v845_v3 = vsel %vm749_vm15, %v781_v51, %v813_v33  ;;  %v909_v45 = vsel %vm749_vm15, %v877_v55, 2.0  ;;  %v842_v22 = vsel %vm746_vm14, %v778_v23, %v810_v8 }
 0x165   : > { %v906_v44 = vsel %vm746_vm14, %v874_v4, 2.0  ;;  %v941_v57 = vadd.f32 %v909_v45, %v845_v3  ;;  %v763_v0 = vadd.f32 1.0, %v699_v46  ;;  %v795_v56 = vadd.f32 %v699_v46, %v667_v59 }
 0x166   : > { %1723 = vrcp.f32 %v925_v49  ;;  %v859_v1 = vmul.f32 2.0, %v667_v59  ;;  %v683_v5 = vmul.f32 %v1716_v43, %v1716_v43  ;;  %v715_v6 = vmul.f32 2.0, %v1716_v43 }
 0x167   : > { %v1718_v48 = vpop.eup %1717  ;;  %1725 = vrcp.f32 %v941_v57  ;;  %v827_v7 = vsel %vm731_vm0, %v763_v0, %v795_v56  ;;  %v938_v10 = vadd.f32 %v906_v44, %v842_v22  ;;  %vm747_vm1 = vcmp.ge.f32.partialorder %v2245_v54, 0.0 }
 0x168   : > { %v1031_v50 = vmul.f32 %v1718_v48, %v967_v32  ;;  %v891_v9 = vsel %vm731_vm0, %v859_v1, 2.0  ;;  %1727 = vrcp.f32 %v922_v61  ;;  %v779_v16 = vadd.f32 1.0, %v715_v6 }
 0x169   : > { %v923_v13 = vadd.f32 %v891_v9, %v827_v7  ;;  %v811_v21 = vadd.f32 %v715_v6, %v683_v5  ;;  %v875_v27 = vmul.f32 2.0, %v683_v5  ;;  %v956_v32 = vmul.f32 %v2273_v26, %v2177_v25 }
 0x16a   : > { %v1450_v62 = vpack.c.bf16 %v1031_v50, %v1030_v31  ;;  %v957_v19 = vmul.f32 %v829_v29, %v2234_v52  ;;  %v972_v35 = vmul.f32 %v2280_v34, %v2182_v24  ;;  %v973_v38 = vmul.f32 %v845_v3, %v2237_v17 }
 0x16b   : > { %1729 = vrcp.f32 %v923_v13  ;;  %v843_v20 = vsel %vm747_vm1, %v779_v16, %v811_v21  ;;  %v907_v28 = vsel %vm747_vm1, %v875_v27, 2.0  ;;  %v954_v25 = vmul.f32 %v2287_v12, %v2185_v58 }
 0x16c   : > { %1478 = vst [vmem:[%s2074_s17 + $0x60] sm:$0xff] %v1450_v62   ;;  %1731 = vrcp.f32 %v938_v10  ;;  %v939_v31 = vadd.f32 %v907_v28, %v843_v20  ;;  %v955_v26 = vmul.f32 %v827_v7, %v2240_v36  ;;  %v970_v4 = vmul.f32 %v842_v22, %v2231_v53 }
 0x16d   : > { %v971_v8 = vmul.f32 %v843_v20, %v2245_v54 }
 0x16e   : > { %1733 = vrcp.f32 %v939_v31 }
 0x16f   : > { %v1720_v30 = vpop.eup %1719 }
 0x170   : > { %v1722_v47 = vpop.eup %1721  ;;  %v1020_v15 = vmul.f32 %v1720_v30, %v956_v32 }
 0x171   : > { %v1036_v41 = vmul.f32 %v1722_v47, %v972_v35 }
 0x173   : > { %v1724_v60 = vpop.eup %1723 }
 0x174   : > { %v1726_v39 = vpop.eup %1725  ;;  %v1021_v18 = vmul.f32 %v1724_v60, %v957_v19 }
 0x175   : > { %v1037_v2 = vmul.f32 %v1726_v39, %v973_v38  ;;  %v1728_v11 = vpop.eup %1727 }
 0x176   : > { %v1425_v14 = vpack.c.bf16 %v1021_v18, %v1020_v15  ;;  %v1018_v24 = vmul.f32 %v1728_v11, %v954_v25 }
 0x177   : > { %v1465_v52 = vpack.c.bf16 %v1037_v2, %v1036_v41 }
 0x178   : > { %v1730_v23 = vpop.eup %1729  ;;  %1473 = vst [vmem:[%s2074_s17 + $0x38] sm:$0xff] %v1425_v14  }
 0x179   : > { %1481 = vst [vmem:[%s2074_s17 + $0x78] sm:$0xff] %v1465_v52   ;;  %v1019_v17 = vmul.f32 %v1730_v23, %v955_v26  ;;  %v1732_v34 = vpop.eup %1731 }
 0x17a   : > { %v1034_v12 = vmul.f32 %v1732_v34, %v970_v4 }
 0x17b   : > { %v1420_v37 = vpack.c.bf16 %v1019_v17, %v1018_v24  ;;  %v1734_v58 = vpop.eup %1733 }
 0x17c   : > { %v1035_v36 = vmul.f32 %v1734_v58, %v971_v8 }
 0x17d   : > { %1472 = vst [vmem:[%s2074_s17 + $0x30] sm:$0xff] %v1420_v37  }
 0x17e   : > { %v1460_v53 = vpack.c.bf16 %v1035_v36, %v1034_v12 }
 0x180   : > { %1480 = vst [vmem:[%s2074_s17 + $0x70] sm:$0xff] %v1460_v53  }
 0x181   : > { %1748 = shalt.err (!%p1745_p3)
}
 0x182   : > { %s1749_s4 = scalar_lea.hbm %s2331_s26, 2048  ;;  %s1753_s7 = scalar_lea.hbm %s2381_s3, 4096 }
 0x183   : > { %p1750_p4 = scmp.ne.s32.totalorder %s2331_s26, %s1749_s4  ;;  %p1754_p9 = scmp.lt.s32.totalorder %s2331_s26, %s2381_s3 }
 0x184   : > { %p1755_p10 = scmp.lt.s32.totalorder %s1753_s7, %s1749_s4 }
 0x185   : > { %p1751_p7 = pnand %p1750_p4, %p1858_p5 }
 0x186   : > { %p1756_p11 = por %p1755_p10, %p1754_p9 }
 0x187   : > { %p1752_p8 = pneg %p1751_p7 }
 0x189   : > { %p1757_p12 = pnand %p1756_p11, %p1752_p8 }
 0x18b   : > { %1760 = shalt.err (!%p1757_p12)
}
 0x18c   : > { %s1798_s10 = smov 64   ;;  %s1799_s11 = smov 4  }
 0x18d   : > { %1547 = dma.vmem_to_hbm [thread:$0]  (%p1858_p5), %s2333_s20, 2048, %s2331_s26, %s2338_s27, %s1798_s10, %s1798_s10, %s1799_s11  }
 0x18e PF: > { %p1553_p13 = scmp.ge.s32.totalorder %s1795_s15, 2  ;;  %s1227_s17 = sand.u32 1, %s1783_s12  }
 0x18f   : > { %s1228_s19 = scalar_lea.sflag [#allocation3], %s1227_s17 }
 0x190   : > { %p1550_p0 = pnand %p1553_p13, %p1862_p6 }
 0x192   : > { %p1551_p1 = pneg %p1550_p0 }
 0x194   : > { %1778 = dma.done.wait (%p1551_p1), %s1228_s19, 2048  }
 0x195   : > { %1780 = vsyncadd (%p1551_p1), %s1228_s19, 4294965248  ;;  %p13_p2 = scmp.ge.s32.totalorder %s1845_s18, 4   ;;  %s2384_s12 = smov %s1787_s13 }
 0x196   : > { %s2385_s13 = smov %s1791_s14  ;;  %s2386_s14 = smov %s1856_s21 }
 0x197   : > { %s2387_s15 = smov %s1845_s18  ;;  %15 = sbr.rel (!%p13_p2) target bundleno = 3 (0x3), region = 67 }
 0x19c   :  { %1233 = vsyncpa [#allocation3], 1 }
 0x19d   :  { %1235 = vsyncpa [#allocation3 + $0x1], 1 }

</bundles_post_ra>
